<compile_context>
chip_gen: v6e
topology: v6e:2x2x1
jax: 0.10.0
libtpu: 0.0.40
codegen_flags: <defaults>
</compile_context>

<pallas_src>
import jax
import jax.numpy as jnp
from jax import lax
from jax.experimental import pallas as pl
from jax.experimental.pallas import tpu as pltpu


def _floor_to(x, m):
    return max(m, (x // m) * m)


# ---------------------------------------------------------------------------
# Fast path: context = column-sum of encoder_outputs (attn weights are 1.0).
# ---------------------------------------------------------------------------
def _make_colsum_kernel(*, s_rows, tile_s, tiles_per_split):
    """out[split] accumulates per-sublane partial column sums of the
    (lane-densified) encoder slab.  Tail / duplicated tiles are masked inside
    the kernel (Pallas does NOT zero out-of-bounds block regions)."""
    sublane_acc = (tile_s % 8 == 0)

    def kernel(enc_ref, out_ref):
        split = pl.program_id(0)
        t = pl.program_id(1)

        @pl.when(t == 0)
        def _init():
            out_ref[...] = jnp.zeros_like(out_ref)

        # Global tile index from the *unclamped* grid position: rows of the
        # tail tile (and of duplicated tiles when the split does not divide
        # the tile count) land at >= s_rows and are masked to zero below.
        tile_idx = split * tiles_per_split + t
        row0 = tile_idx * tile_s

        enc = enc_ref[...].astype(jnp.float32)                  # (tile_s, L)
        rows = row0 + lax.broadcasted_iota(jnp.int32, (tile_s, 1), 0)
        enc = jnp.where(rows < s_rows, enc, 0.0)

        if sublane_acc:
            # Per-sublane partial sums: pure VPU adds per tile; the single
            # cross-sublane (XLU) reduction is done once in the wrapper.
            part = enc.reshape(tile_s // 8, 8, enc.shape[-1]).sum(axis=0)
        else:
            # Tiny single-tile fallback (tile_s == s_rows, not 8-aligned).
            part = jnp.sum(enc, axis=0, keepdims=True)
        out_ref[...] += part[None]

    return kernel


def attn_add_forward(encoder_outputs, hidden, params=None, *,
                     tile_rows=None, n_split=None):
    """Optimized forward for Attn(mode='add').

    encoder_outputs: (S, 1, H), hidden: (1, 1, H) -> context (1, 1, H).
    Relies on the legacy singleton-row nn.Softmax() making every attention
    weight exactly 1.0, so hidden / U / W / V never influence the output.
    (Only valid for this module's mode='add' semantics.)
    """
    assert encoder_outputs.ndim == 3 and encoder_outputs.shape[1] == 1
    assert hidden.ndim == 3 and hidden.shape[0] == 1 and hidden.shape[1] == 1
    S, _, H = encoder_outputs.shape
    del hidden, params  # provably dead for the final context (see header)

    # Lane densification: view (S, H) as (S/k, k*H) so H < 128 does not leave
    # lanes dead and the output store is unmasked.  Contiguous row-major
    # reshape -> no HBM copy; the slab keeps its native dtype (cast in-kernel).
    k = 1
    if H < 128 and 128 % H == 0:
        k = 128 // H
        while k > 1 and S % k != 0:
            k //= 2
    s_rows, L = S // k, k * H
    enc = encoder_outputs.reshape(s_rows, L)

    itemsize = enc.dtype.itemsize
    if tile_rows is None:
        # ~4 MiB per (double-buffered) encoder tile.
        tile_rows = max(8, min((4 << 20) // max(1, L * itemsize), 32768))
    tile_rows = _floor_to(int(tile_rows), 8)

    if s_rows <= tile_rows:
        tile_s, n_tiles = s_rows, 1          # block == full array dims
    else:
        tile_s, n_tiles = tile_rows, pl.cdiv(s_rows, tile_rows)

    if n_split is None:
        n_split = 2 if n_tiles >= 2 else 1   # feeds v7x's two TensorCores;
    n_split = max(1, min(int(n_split), n_tiles))  # harmless (iterated) on 1-TC chips
    tiles_per_split = pl.cdiv(n_tiles, n_split)

    acc_rows = 8 if tile_s % 8 == 0 else 1

    if n_split * tiles_per_split == n_tiles:
        enc_index_map = lambda s, t: (s * tiles_per_split + t, 0)
    else:
        # Clamp duplicated trailing tile slots to a valid block; their row
        # indices are >= s_rows so the in-kernel mask zeroes their contribution.
        enc_index_map = lambda s, t: (
            jnp.minimum(s * tiles_per_split + t, n_tiles - 1), 0)

    tile_bytes = tile_s * L * itemsize
    vmem_limit = int(min(max(4 * tile_bytes + (4 << 20), 16 << 20), 48 << 20))

    kernel = _make_colsum_kernel(s_rows=s_rows, tile_s=tile_s,
                                 tiles_per_split=tiles_per_split)

    out = pl.pallas_call(
        kernel,
        out_shape=jax.ShapeDtypeStruct((n_split, acc_rows, L), jnp.float32),
        grid_spec=pltpu.PrefetchScalarGridSpec(
            num_scalar_prefetch=0,
            grid=(n_split, tiles_per_split),
            in_specs=[pl.BlockSpec((tile_s, L), enc_index_map)],
            out_specs=pl.BlockSpec((1, acc_rows, L), lambda s, t: (s, 0, 0)),
        ),
        compiler_params=pltpu.CompilerParams(
            dimension_semantics=("parallel", "arbitrary"),
            vmem_limit_bytes=vmem_limit),
        cost_estimate=pl.CostEstimate(
            flops=int(S * H),
            transcendentals=0,
            bytes_accessed=int(S * H * itemsize + n_split * acc_rows * L * 4)),
    )(enc)

    # Tiny wrapper-side folds: splits + sublanes + densified lane groups.
    ctx = out.sum(axis=(0, 1)).reshape(k, H).sum(axis=0)        # (H,)
    return ctx.reshape(1, 1, H).astype(encoder_outputs.dtype)


# ---------------------------------------------------------------------------
# Full score path (kept for fidelity), optimized per review.
# ---------------------------------------------------------------------------
def _make_attn_score_kernel(*, s_valid, tile_s):
    def kernel(enc_ref, uwt_ref, bias_ref, vrow_ref, vb_ref, ctx_ref):
        t = pl.program_id(0)

        @pl.when(t == 0)
        def _init():
            ctx_ref[...] = jnp.zeros_like(ctx_ref)

        enc = enc_ref[...].astype(jnp.float32)                  # (tile_s, H)
        rows = t * tile_s + lax.broadcasted_iota(jnp.int32, (tile_s, 1), 0)
        valid = rows < s_valid

        # Score pipeline (kept for fidelity with the module's forward):
        # single bf16 MXU matmul per tile -- W(hidden)+biases pre-folded into
        # `bias` in the wrapper; V (out_features==1) as a lane reduction.
        u = jnp.dot(enc.astype(jnp.bfloat16), uwt_ref[...],
                    preferred_element_type=jnp.float32)          # (tile_s, A)
        poly = jnp.tanh(u + bias_ref[...])
        scores = (jnp.sum(poly * vrow_ref[...], axis=-1, keepdims=True)
                  + vb_ref[...])                                 # (tile_s, 1)

        # Legacy nn.Softmax() (implicit dim=1) normalises each singleton row
        # of the (S, 1) score column, so every weight is exactly 1.0.  Folding
        # it to ones is bit-identical and frees EUP/XLU slots (the compiler
        # may DCE the now-dead score pipeline, which is the honest optimum).
        attn = jnp.ones_like(scores)

        # context += attn^T @ enc, as a masked broadcast-multiply + sublane
        # reduction into the resident (1, H) accumulator (no pad: tail rows
        # of the last tile are masked here).
        contrib = jnp.where(valid, attn * enc, 0.0)
        ctx_ref[...] += jnp.sum(contrib, axis=0, keepdims=True)

    return kernel


def prepare_params(params):
    """One-time layout prep (hoisted out of the per-call path): pre-transpose
    the Linear weights to (in, out), keep the U projection in bf16 for the
    MXU, reshape biases / V row to 2-D."""
    A, H = params["U_w"].shape
    return {
        "U_wT": jnp.transpose(params["U_w"]).astype(jnp.bfloat16),  # (H, A)
        "W_wT": jnp.transpose(params["W_w"]),                       # (H, A) f32
        "U_b": params["U_b"].reshape(1, A),
        "W_b": params["W_b"].reshape(1, A),
        "V_row": params["V_w"].reshape(1, A),
        "V_b": params["V_b"].reshape(1, 1),
    }


def attn_add_forward_full(encoder_outputs, hidden, prep, *, tile_rows=None):
    """Forward keeping the full U/W/V/tanh score path (optimized)."""
    assert encoder_outputs.ndim == 3 and encoder_outputs.shape[1] == 1
    assert hidden.ndim == 3 and hidden.shape[0] == 1 and hidden.shape[1] == 1
    S, _, H = encoder_outputs.shape
    A = prep["U_wT"].shape[1]

    enc = encoder_outputs.reshape(S, H)                    # native dtype stream
    hid = hidden.reshape(1, H).astype(jnp.float32)

    # Fold the M=1 projection W(hidden) and both biases into one (1, A) row
    # outside the kernel (trivially cheap; overlappable via cost_estimate).
    bias = hid @ prep["W_wT"] + prep["W_b"] + prep["U_b"]  # (1, A) f32

    itemsize = enc.dtype.itemsize
    if tile_rows is None:
        tile_rows = max(8, min((4 << 20) // max(1, H * itemsize), 32768))
    tile_rows = _floor_to(int(tile_rows), 8)
    if S <= tile_rows:
        tile_s, n_tiles = S, 1
    else:
        tile_s, n_tiles = tile_rows, pl.cdiv(S, tile_rows)

    tile_bytes = tile_s * H * itemsize
    w_bytes = H * A * 2                                    # bf16 U weight
    vmem_limit = int(min(max(4 * tile_bytes + 2 * w_bytes + (8 << 20),
                             16 << 20), 48 << 20))

    kernel = _make_attn_score_kernel(s_valid=S, tile_s=tile_s)

    ctx = pl.pallas_call(
        kernel,
        out_shape=jax.ShapeDtypeStruct((1, H), jnp.float32),
        grid_spec=pltpu.PrefetchScalarGridSpec(
            num_scalar_prefetch=0,
            grid=(n_tiles,),
            in_specs=[
                pl.BlockSpec((tile_s, H), lambda i: (i, 0)),   # enc tile
                # NOTE: the grid-invariant operands below would ideally be
                # single-buffered (pipeline_mode=pl.Buffered(1)) to save VMEM
                # on v7x for large H*A; kept default-buffered for portability
                # and accounted for in vmem_limit / tile sizing instead.
                pl.BlockSpec((H, A), lambda i: (0, 0)),        # U weight (bf16)
                pl.BlockSpec((1, A), lambda i: (0, 0)),        # folded bias
                pl.BlockSpec((1, A), lambda i: (0, 0)),        # V row
                pl.BlockSpec((1, 1), lambda i: (0, 0)),        # V bias
            ],
            out_specs=pl.BlockSpec((1, H), lambda i: (0, 0)),
        ),
        compiler_params=pltpu.CompilerParams(
            dimension_semantics=("arbitrary",),
            vmem_limit_bytes=vmem_limit),
        cost_estimate=pl.CostEstimate(
            flops=int(2 * S * H * A + 4 * S * A + 2 * S * H),
            transcendentals=int(S * A),
            bytes_accessed=int(S * H * itemsize + H * A * 2 + (H + 3 * A) * 4)),
    )(enc, prep["U_wT"], bias, prep["V_row"], prep["V_b"])

    return ctx.reshape(1, 1, H).astype(encoder_outputs.dtype)


# ---------------------------------------------------------------------------
# Pure-JAX reference mirroring the PyTorch forward (mode='add').
# ---------------------------------------------------------------------------
def attn_add_reference(encoder_outputs, hidden, params):
    S, _, H = encoder_outputs.shape
    enc = encoder_outputs.reshape(S, H).astype(jnp.float32)     # (S, H)
    hid = hidden.reshape(-1).astype(jnp.float32)                # (H,)
    w_hid = hid @ params["W_w"].T + params["W_b"]               # (A,)
    u_enc = enc @ params["U_w"].T + params["U_b"]               # (S, A)
    poly_v = jnp.tanh(u_enc + w_hid) @ params["V_w"].T + params["V_b"]  # (S,1)
    attn = jax.nn.softmax(poly_v, axis=1)                       # singleton rows -> 1.0
    ctx = jnp.matmul(attn.T, enc, precision=lax.Precision.HIGHEST)      # (1, H)
    return ctx[None]                                            # (1, 1, H)


def init_params(key, hidden_size, attn_size):
    ks = jax.random.split(key, 6)
    s_h = 1.0 / jnp.sqrt(hidden_size)
    s_a = 1.0 / jnp.sqrt(attn_size)
    return {
        "U_w": jax.random.uniform(ks[0], (attn_size, hidden_size),
                                  jnp.float32, -s_h, s_h),
        "U_b": jax.random.uniform(ks[1], (attn_size,), jnp.float32, -s_h, s_h),
        "W_w": jax.random.uniform(ks[2], (attn_size, hidden_size),
                                  jnp.float32, -s_h, s_h),
        "W_b": jax.random.uniform(ks[3], (attn_size,), jnp.float32, -s_h, s_h),
        "V_w": jax.random.uniform(ks[4], (1, attn_size),
                                  jnp.float32, -s_a, s_a),
        "V_b": jax.random.uniform(ks[5], (1,), jnp.float32, -s_a, s_a),
    }


if __name__ == "__main__":
    SEQ, HIDDEN, ATTN = 8, 32, 128

    key = jax.random.PRNGKey(0)
    k_enc, k_hid, k_par, k_enc2 = jax.random.split(key, 4)

    # Shapes as the module expects pre-squeeze: (S, 1, H) and (1, 1, H).
    encoder_outputs = jax.random.normal(k_enc, (SEQ, 1, HIDDEN), jnp.float32)
    hidden = jax.random.normal(k_hid, (1, 1, HIDDEN), jnp.float32)
    params = init_params(k_par, HIDDEN, ATTN)

    ref = attn_add_reference(encoder_outputs, hidden, params)

    # Optimized path (lane-densified column-sum kernel).
    ctx_fast = attn_add_forward(encoder_outputs, hidden, params)
    jax.block_until_ready(ctx_fast)
    assert ctx_fast.shape == (1, 1, HIDDEN), ctx_fast.shape
    assert jnp.allclose(ctx_fast, ref, atol=1e-4, rtol=1e-4), (
        "fast Pallas kernel mismatch vs JAX reference")

    # Full score-path kernel (fidelity variant).
    prep = prepare_params(params)
    ctx_full = attn_add_forward_full(encoder_outputs, hidden, prep)
    jax.block_until_ready(ctx_full)
    assert ctx_full.shape == (1, 1, HIDDEN), ctx_full.shape
    assert jnp.allclose(ctx_full, ref, atol=1e-4, rtol=1e-4), (
        "full Pallas kernel mismatch vs JAX reference")

    # Larger sequence exercising multi-tile grids, in-kernel tail masking
    # (no wrapper pad), per-sublane accumulation and the 2-way core split.
    SEQ2 = 1000
    enc2 = jax.random.normal(k_enc2, (SEQ2, 1, HIDDEN), jnp.float32)
    ref2 = attn_add_reference(enc2, hidden, params)

    ctx2_fast = attn_add_forward(enc2, hidden, params, tile_rows=64, n_split=2)
    jax.block_until_ready(ctx2_fast)
    assert jnp.allclose(ctx2_fast, ref2, atol=1e-3, rtol=1e-3), (
        "fast Pallas kernel (tiled/masked/split) mismatch vs JAX reference")

    ctx2_full = attn_add_forward_full(enc2, hidden, prep, tile_rows=128)
    jax.block_until_ready(ctx2_full)
    assert jnp.allclose(ctx2_full, ref2, atol=1e-3, rtol=1e-3), (
        "full Pallas kernel (tiled/masked) mismatch vs JAX reference")

    print("KERNEL_OK")
</pallas_src>

<mosaic_0001>
module attributes {stable_mosaic.version = 11 : i64} {
  func.func @kernel(%arg0: i32, %arg1: i32, %arg2: memref<2x128xf32, #tpu.memory_space<vmem>>, %arg3: memref<1x1x128xf32, #tpu.memory_space<vmem>>) attributes {dimension_semantics = [#tpu.dimension_semantics<parallel>, #tpu.dimension_semantics<arbitrary>], iteration_bounds = array<i64: 1, 1>, scalar_prefetch = 0 : i64, scratch_operands = 0 : i64, tpu.core_type = #tpu.core_type<tc>, window_params = [{transform_indices = @transform_0, window_bounds = array<i64: 2, 128>}, {transform_indices = @transform_1, window_bounds = array<i64: 1, 1, 128>}]} {
    %c0_i32 = arith.constant 0 : i32
    %0 = arith.cmpi eq, %arg1, %c0_i32 : i32
    %1 = arith.extui %0 : i1 to i32
    %c0_i32_0 = arith.constant 0 : i32
    %2 = arith.cmpi ne, %1, %c0_i32_0 : i32
    scf.if %2 {
      %cst_10 = arith.constant 0.000000e+00 : f32
      %22 = vector.broadcast %cst_10 : f32 to vector<1x1x128xf32>
      %c0_11 = arith.constant 0 : index
      %c0_12 = arith.constant 0 : index
      %c0_13 = arith.constant 0 : index
      %23 = vector.load %arg3[%c0_11, %c0_12, %c0_13] : memref<1x1x128xf32, #tpu.memory_space<vmem>>, vector<1x1x128xf32>
      tpu.vector_store %arg3[%c0_11, %c0_12, %c0_13], %22 {strides = array<i32>} : memref<1x1x128xf32, #tpu.memory_space<vmem>>, vector<1x1x128xf32>,
    } else {
    }
    %c1_i32 = arith.constant 1 : i32
    %3 = arith.muli %arg0, %c1_i32 : i32
    %4 = arith.addi %3, %arg1 : i32
    %c2_i32 = arith.constant 2 : i32
    %5 = arith.muli %4, %c2_i32 : i32
    %c0 = arith.constant 0 : index
    %c0_1 = arith.constant 0 : index
    %6 = vector.load %arg2[%c0, %c0_1] : memref<2x128xf32, #tpu.memory_space<vmem>>, vector<2x128xf32>
    %7 = tpu.iota {dimensions = array<i32: 0>} : vector<2x1xi32>
    %8 = vector.broadcast %5 : i32 to vector<2x1xi32>
    %9 = arith.addi %8, %7 : vector<2x1xi32>
    %c2_i32_2 = arith.constant 2 : i32
    %10 = vector.broadcast %c2_i32_2 : i32 to vector<2x1xi32>
    %11 = arith.cmpi slt, %9, %10 : vector<2x1xi32>
    %cst = arith.constant 0.000000e+00 : f32
    %12 = vector.shape_cast %11 : vector<2x1xi1> to vector<2x1xi1>
    %13 = vector.broadcast %12 : vector<2x1xi1> to vector<2x128xi1>
    %14 = vector.broadcast %cst : f32 to vector<2x128xf32>
    %15 = arith.select %13, %6, %14 : vector<2x128xi1>, vector<2x128xf32>
    %cst_3 = arith.constant dense<0.000000e+00> : vector<128xf32>
    %16 = vector.multi_reduction <add>, %15, %cst_3 [0] : vector<2x128xf32> to vector<128xf32>
    %17 = vector.shape_cast %16 : vector<128xf32> to vector<1x128xf32>
    %c0_4 = arith.constant 0 : index
    %c0_5 = arith.constant 0 : index
    %c0_6 = arith.constant 0 : index
    %18 = vector.load %arg3[%c0_4, %c0_5, %c0_6] : memref<1x1x128xf32, #tpu.memory_space<vmem>>, vector<1x1x128xf32>
    %19 = vector.shape_cast %17 : vector<1x128xf32> to vector<1x1x128xf32>
    %20 = arith.addf %18, %19 : vector<1x1x128xf32>
    %c0_7 = arith.constant 0 : index
    %c0_8 = arith.constant 0 : index
    %c0_9 = arith.constant 0 : index
    %21 = vector.load %arg3[%c0_7, %c0_8, %c0_9] : memref<1x1x128xf32, #tpu.memory_space<vmem>>, vector<1x1x128xf32>
    tpu.vector_store %arg3[%c0_7, %c0_8, %c0_9], %20 {strides = array<i32>} : memref<1x1x128xf32, #tpu.memory_space<vmem>>, vector<1x1x128xf32>,
    return
  }
  func.func @transform_0(%arg0: i32, %arg1: i32) -> (i32, i32) {
    %c1_i32 = arith.constant 1 : i32
    %0 = arith.muli %arg0, %c1_i32 : i32
    %1 = arith.addi %0, %arg1 : i32
    %c0_i32 = arith.constant 0 : i32
    %c0_i32_0 = arith.constant 0 : i32
    return %1, %c0_i32 : i32, i32
  }
  func.func @transform_1(%arg0: i32, %arg1: i32) -> (i32, i32, i32) {
    %c0_i32 = arith.constant 0 : i32
    %c0_i32_0 = arith.constant 0 : i32
    %c0_i32_1 = arith.constant 0 : i32
    return %arg0, %c0_i32, %c0_i32_0 : i32, i32, i32
  }
}

</mosaic_0001>

<bundles_post_ra>
// kernel: tpu_custom_call.1
= control target key start
LH: loop header
LB: loop body
LE: loop exit
PB: predicated region body
PF: predicated region fallthrough
CT: control target
= control target key end

     0   :  { %6 = vsyncpa [#allocation3], 0  ;;  %s134_s0 = inlined_call_operand.hbm [shape: f32[2,128], index: 0, kind: input, shape index: {}]   ;;  %s135_s1 = inlined_call_operand.hbm [shape: f32[1,1,128], index: 1, kind: output, shape index: {}]  }
   0x1   :  { %7 = vsyncpa [#allocation4], 0  ;;  %s115_s6 = smov [#allocation2]  }
   0x2   :  { %s17_s7 = sshll.u32 %s115_s6, 4  ;;  %s18_s7 = int_to_ptr.vmem [resolvable:$true] %s17_s7 }
   0x3   :  { %s79_s8 = scalar_lea.vmem %s18_s7, 32  ;;  %p84_p1 = scmp.lt.s32.totalorder %s18_s7, %s18_s7 }
   0x4   :  { %p80_p0 = scmp.ne.s32.totalorder %s18_s7, %s79_s8  ;;  %p85_p2 = scmp.lt.s32.totalorder %s79_s8, %s79_s8 }
   0x6   :  { %p86_p3 = por %p85_p2, %p84_p1 }
   0x8   :  { %p87_p4 = pnand %p86_p3, %p80_p0 }
   0xa   :  { %90 = shalt.err (!%p87_p4)
}
   0xb   :  { %20 = dma.hbm_to_vmem [thread:$0]  %s134_s0, 32, %s18_s7, [#allocation3]  }
   0xc   :  { %111 = dma.done.wait [#allocation3], 32  }
   0xd   :  { %112 = vsyncadd [#allocation3], 4294967264  ;;  %v116_v0 = vmov 0.0   ;;  %vm41_vm0 = vcmask 1041408   ;;  %v67_v1 = vld [vmem:[#allocation2] sm:$0x3] }
   0xe   :  { %29 = vst [vmem:[#allocation5] sm:$0x1] %v116_v0  ;;  %v42_v2 = vsel %vm41_vm0, %v67_v1, 0.0  ;;  %s117_s11 = smov [#allocation5]  }
   0xf   :  { %v43_v3 = vrot.slane %v42_v2, 4  ;;  %s58_s12 = sshll.u32 %s117_s11, 4  ;;  %s59_s12 = int_to_ptr.vmem [resolvable:$true] %s58_s12 }
  0x10   :  { %s91_s0 = scalar_lea.vmem %s59_s12, 16  ;;  %s95_s13 = scalar_lea.vmem %s59_s12, 32 }
  0x11   :  { %v44_v4 = vadd.f32 %v43_v3, %v42_v2  ;;  %p92_p5 = scmp.ne.s32.totalorder %s59_s12, %s91_s0  ;;  %p96_p6 = scmp.lt.s32.totalorder %s59_s12, %s59_s12 }
  0x12   :  { %p97_p7 = scmp.lt.s32.totalorder %s95_s13, %s91_s0 }
  0x13   :  { %v45_v5 = vrot.slane %v44_v4, 2 }
  0x14   :  { %p98_p8 = por %p97_p7, %p96_p6 }
  0x15   :  { %v46_v6 = vadd.f32 %v45_v5, %v44_v4  ;;  %v49_v8 = vld [vmem:[#allocation5] sm:$0x1] }
  0x16   :  { %p99_p9 = pnand %p98_p8, %p92_p5 }
  0x17   :  { %v47_v7 = vrot.slane %v46_v6, 1 }
  0x19   :  { %v48_v9 = vadd.f32 %v47_v7, %v46_v6 }
  0x1b   :  { %v50_v10 = vadd.f32 %v49_v8, %v48_v9 }
  0x1d   :  { %51 = vst [vmem:[#allocation5] sm:$0x1] %v50_v10 }
  0x1e   :  { %102 = shalt.err (!%p99_p9)
}
  0x1f   :  { %61 = dma.vmem_to_hbm [thread:$0]  %s59_s12, 16, %s135_s1, [#allocation4]  }
  0x20   :  { %113 = dma.done.wait [#allocation4], 16  }
  0x21   :  { %114 = vsyncadd [#allocation4], 4294967280 }
  0x22   :  { %65 = vsyncpa [#allocation3], 1 }
  0x23   :  { %66 = vsyncpa [#allocation4], 1 }

</bundles_post_ra>
